<compile_context>
chip_gen: v7x
topology: tpu7x:2x2x1
jax: 0.10.0
libtpu: 0.0.40
codegen_flags: <defaults>
</compile_context>

<pallas_src>
import functools

import numpy as np

import jax
import jax.numpy as jnp
from jax.experimental import pallas as pl
from jax.experimental.pallas import tpu as pltpu

LANE = 128
SUBLANE = 8


def _round_up(x, m):
    return ((x + m - 1) // m) * m


def hand_mlp_kernel(x_ref, w1_ref, b1_ref, w2_ref, b2_ref, w3_ref, b3_ref, o_ref):
    x = x_ref[...]  # (bb, n_in) f32

    # fc1 + ReLU   (dropout_1 is identity in eval mode). Hidden dim is padded
    # to 128 lanes with zero weights/bias, so padded columns stay exactly 0.
    h1 = jnp.dot(x, w1_ref[...], preferred_element_type=jnp.float32) + b1_ref[...]
    h1 = jnp.maximum(h1, 0.0)

    # fc2 + ReLU   (dropout_2 is identity in eval mode).
    h2 = jnp.dot(h1, w2_ref[...], preferred_element_type=jnp.float32) + b2_ref[...]
    h2 = jnp.maximum(h2, 0.0)

    # fc3 -> logits over the real n_out classes only (output is NOT lane-padded:
    # the HBM writeback is the dominant stream, keep it at n_out columns).
    logits = jnp.dot(h2, w3_ref[...], preferred_element_type=jnp.float32) + b3_ref[...]

    # Numerically stable softmax over the class axis (exact divide on purpose).
    m = jnp.max(logits, axis=-1, keepdims=True)
    e = jnp.exp(logits - m)
    denom = jnp.sum(e, axis=-1, keepdims=True)
    o_ref[...] = (e / denom).astype(o_ref.dtype)


def prepare_params(params):
    """One-time prep: transpose PyTorch (out,in) weights to (in,out) and
    zero-pad the hidden (intermediate) lane dims up to multiples of 128.
    The output/class dim is intentionally NOT padded. Returns arrays only
    (no Python ints -> safe to pass through jit)."""
    f32 = jnp.float32
    w1 = params["fc1_w"].T.astype(f32)  # (n_in, n_hid)
    w2 = params["fc2_w"].T.astype(f32)  # (n_hid, 10)
    w3 = params["fc3_w"].T.astype(f32)  # (10,   n_out)
    n_in, n_hid = w1.shape
    mid, n_out = w3.shape

    n_hid_p = _round_up(n_hid, LANE)
    mid_p = _round_up(mid, LANE)

    w1p = jnp.zeros((n_in, n_hid_p), f32).at[:, :n_hid].set(w1)
    b1p = jnp.zeros((1, n_hid_p), f32).at[0, :n_hid].set(params["fc1_b"].astype(f32))
    w2p = jnp.zeros((n_hid_p, mid_p), f32).at[:n_hid, :mid].set(w2)
    b2p = jnp.zeros((1, mid_p), f32).at[0, :mid].set(params["fc2_b"].astype(f32))
    w3p = jnp.zeros((mid_p, n_out), f32).at[:mid, :].set(w3)
    b3p = params["fc3_b"].astype(f32).reshape(1, n_out)

    return {"w1": w1p, "b1": b1p, "w2": w2p, "b2": b2p, "w3": w3p, "b3": b3p}


@functools.partial(jax.jit, static_argnames=("block_b",))
def hand_mlp_forward(x, prepared, *, block_b=4096):
    """x: (B, n_in) float32.  prepared: output of prepare_params()."""
    w1, b1 = prepared["w1"], prepared["b1"]
    w2, b2 = prepared["w2"], prepared["b2"]
    w3, b3 = prepared["w3"], prepared["b3"]
    n_out = w3.shape[1]          # static under jit (array shape)

    B, n_in = x.shape            # static under jit
    x = x.astype(jnp.float32)

    # Batch block: multiple of 8 sublanes, capped at ~ceil(B/2) so the
    # "parallel" grid has >=2 steps (megacore sharding on v7x) once B >= 16,
    # and capped by block_b to bound per-step VMEM (~<8 MiB at bb=4096).
    half = _round_up(pl.cdiv(B, 2), SUBLANE)
    bb = max(SUBLANE, min(_round_up(block_b, SUBLANE), half))
    grid = (pl.cdiv(B, bb),)     # ragged last block: OOB output rows dropped

    const = lambda a: pl.BlockSpec(a.shape, lambda i: (0, 0))  # VMEM-resident

    out = pl.pallas_call(
        hand_mlp_kernel,
        out_shape=jax.ShapeDtypeStruct((B, n_out), jnp.float32),
        grid_spec=pltpu.PrefetchScalarGridSpec(
            num_scalar_prefetch=0,
            grid=grid,
            in_specs=[
                pl.BlockSpec((bb, n_in), lambda i: (i, 0)),   # n_in NOT lane-padded
                const(w1), const(b1),
                const(w2), const(b2),
                const(w3), const(b3),
            ],
            out_specs=pl.BlockSpec((bb, n_out), lambda i: (i, 0)),
        ),
        compiler_params=pltpu.CompilerParams(
            dimension_semantics=("parallel",),
            vmem_limit_bytes=32 << 20,
        ),
    )(x, w1, b1, w2, b2, w3, b3)

    return out  # already exactly (B, n_out) — no wrapper slice / extra HBM pass


def xavier_normal(key, shape):
    """Matches torch.nn.init.xavier_normal_ for a (fan_out, fan_in) Linear weight."""
    fan_out, fan_in = shape
    std = (2.0 / (fan_in + fan_out)) ** 0.5
    return std * jax.random.normal(key, shape, dtype=jnp.float32)


def make_params(key, n_in, n_hid, n_out):
    k1, k2, k3 = jax.random.split(key, 3)
    return {
        "fc1_w": xavier_normal(k1, (n_hid, n_in)),
        "fc1_b": jnp.zeros((n_hid,), jnp.float32),
        "fc2_w": xavier_normal(k2, (10, n_hid)),
        "fc2_b": jnp.zeros((10,), jnp.float32),
        "fc3_w": xavier_normal(k3, (n_out, 10)),
        "fc3_b": jnp.zeros((n_out,), jnp.float32),
    }


def _reference_numpy(x, params):
    """Float64 ground-truth reference (independent of TPU matmul precision)."""
    x = np.asarray(x, dtype=np.float64)
    w1 = np.asarray(params["fc1_w"], np.float64); b1 = np.asarray(params["fc1_b"], np.float64)
    w2 = np.asarray(params["fc2_w"], np.float64); b2 = np.asarray(params["fc2_b"], np.float64)
    w3 = np.asarray(params["fc3_w"], np.float64); b3 = np.asarray(params["fc3_b"], np.float64)
    h1 = np.maximum(x @ w1.T + b1, 0.0)
    h2 = np.maximum(h1 @ w2.T + b2, 0.0)
    logits = h2 @ w3.T + b3
    z = logits - logits.max(axis=1, keepdims=True)
    e = np.exp(z)
    return e / e.sum(axis=1, keepdims=True)


if __name__ == "__main__":
    # Small, module-consistent shapes: 21 hand landmarks x 2 coords -> 3 gestures.
    n_in, n_hid, n_out = 42, 32, 3

    key = jax.random.PRNGKey(0)
    kp, kx1, kx2, kx3 = jax.random.split(key, 4)
    params = make_params(kp, n_in, n_hid, n_out)
    prepared = prepare_params(params)

    def check(x, block_b):
        out = jax.block_until_ready(hand_mlp_forward(x, prepared, block_b=block_b))
        ref = _reference_numpy(x, params)
        assert out.shape == ref.shape, (out.shape, ref.shape)
        err = float(np.max(np.abs(np.asarray(out, dtype=np.float64) - ref)))
        # Tolerance covers TPU MXU bf16-pass f32 matmul rounding vs. the f64 reference.
        assert err < 2e-3, f"mismatch vs reference: max|err|={err:.3e}"
        assert np.allclose(np.asarray(out).sum(axis=1), 1.0, atol=1e-4), "rows must sum to 1"

    # Case 1: tiny batch, single grid step (bb == B == 8).
    check(jax.random.normal(kx1, (8, n_in), dtype=jnp.float32), 4096)
    # Case 2: batch not a multiple of the block -> 2 grid steps + ragged last block.
    check(jax.random.normal(kx2, (200, n_in), dtype=jnp.float32), 128)
    # Case 3: batch not a multiple of 8 sublanes -> sublane-unaligned ragged tail.
    check(jax.random.normal(kx3, (13, n_in), dtype=jnp.float32), 4096)

    print("KERNEL_OK")
</pallas_src>

<mosaic_0001>
module attributes {stable_mosaic.version = 11 : i64} {
  func.func @hand_mlp_kernel(%arg0: i32, %arg1: memref<8x42xf32, #tpu.memory_space<vmem>>, %arg2: memref<42x128xf32, #tpu.memory_space<vmem>>, %arg3: memref<1x128xf32, #tpu.memory_space<vmem>>, %arg4: memref<128x128xf32, #tpu.memory_space<vmem>>, %arg5: memref<1x128xf32, #tpu.memory_space<vmem>>, %arg6: memref<128x3xf32, #tpu.memory_space<vmem>>, %arg7: memref<1x3xf32, #tpu.memory_space<vmem>>, %arg8: memref<8x3xf32, #tpu.memory_space<vmem>>) attributes {dimension_semantics = [#tpu.dimension_semantics<parallel>], iteration_bounds = array<i64: 1>, scalar_prefetch = 0 : i64, scratch_operands = 0 : i64, tpu.core_type = #tpu.core_type<tc>, window_params = [{transform_indices = @transform_0, window_bounds = array<i64: 8, 42>}, {pipeline_mode = #tpu.pipeline_mode<synchronous>, transform_indices = @transform_1, window_bounds = array<i64: 42, 128>}, {pipeline_mode = #tpu.pipeline_mode<synchronous>, transform_indices = @transform_2, window_bounds = array<i64: 1, 128>}, {pipeline_mode = #tpu.pipeline_mode<synchronous>, transform_indices = @transform_3, window_bounds = array<i64: 128, 128>}, {pipeline_mode = #tpu.pipeline_mode<synchronous>, transform_indices = @transform_4, window_bounds = array<i64: 1, 128>}, {pipeline_mode = #tpu.pipeline_mode<synchronous>, transform_indices = @transform_5, window_bounds = array<i64: 128, 3>}, {pipeline_mode = #tpu.pipeline_mode<synchronous>, transform_indices = @transform_6, window_bounds = array<i64: 1, 3>}, {transform_indices = @transform_7, window_bounds = array<i64: 8, 3>}]} {
    %c0 = arith.constant 0 : index
    %c0_0 = arith.constant 0 : index
    %0 = vector.load %arg1[%c0, %c0_0] : memref<8x42xf32, #tpu.memory_space<vmem>>, vector<8x42xf32>
    %c0_1 = arith.constant 0 : index
    %c0_2 = arith.constant 0 : index
    %1 = vector.load %arg2[%c0_1, %c0_2] : memref<42x128xf32, #tpu.memory_space<vmem>>, vector<42x128xf32>
    %cst = arith.constant dense<0.000000e+00> : vector<8x128xf32>
    %2 = tpu.matmul %0, %1, %cst {dimension_numbers = #tpu.dot_dimension_numbers<[1], [0], [0], [1], [0, 0, 1, 1], [], []>} : vector<8x42xf32>, vector<42x128xf32>, vector<8x128xf32> -> vector<8x128xf32>
    %c0_3 = arith.constant 0 : index
    %c0_4 = arith.constant 0 : index
    %3 = vector.load %arg3[%c0_3, %c0_4] : memref<1x128xf32, #tpu.memory_space<vmem>>, vector<1x128xf32>
    %4 = vector.broadcast %3 : vector<1x128xf32> to vector<8x128xf32>
    %5 = arith.addf %2, %4 : vector<8x128xf32>
    %cst_5 = arith.constant 0.000000e+00 : f32
    %6 = vector.broadcast %cst_5 : f32 to vector<8x128xf32>
    %7 = arith.maximumf %5, %6 : vector<8x128xf32>
    %c0_6 = arith.constant 0 : index
    %c0_7 = arith.constant 0 : index
    %8 = vector.load %arg4[%c0_6, %c0_7] : memref<128x128xf32, #tpu.memory_space<vmem>>, vector<128x128xf32>
    %cst_8 = arith.constant dense<0.000000e+00> : vector<8x128xf32>
    %9 = tpu.matmul %7, %8, %cst_8 {dimension_numbers = #tpu.dot_dimension_numbers<[1], [0], [0], [1], [0, 0, 1, 1], [], []>} : vector<8x128xf32>, vector<128x128xf32>, vector<8x128xf32> -> vector<8x128xf32>
    %c0_9 = arith.constant 0 : index
    %c0_10 = arith.constant 0 : index
    %10 = vector.load %arg5[%c0_9, %c0_10] : memref<1x128xf32, #tpu.memory_space<vmem>>, vector<1x128xf32>
    %11 = vector.broadcast %10 : vector<1x128xf32> to vector<8x128xf32>
    %12 = arith.addf %9, %11 : vector<8x128xf32>
    %cst_11 = arith.constant 0.000000e+00 : f32
    %13 = vector.broadcast %cst_11 : f32 to vector<8x128xf32>
    %14 = arith.maximumf %12, %13 : vector<8x128xf32>
    %c0_12 = arith.constant 0 : index
    %c0_13 = arith.constant 0 : index
    %15 = vector.load %arg6[%c0_12, %c0_13] : memref<128x3xf32, #tpu.memory_space<vmem>>, vector<128x3xf32>
    %cst_14 = arith.constant dense<0.000000e+00> : vector<8x3xf32>
    %16 = tpu.matmul %14, %15, %cst_14 {dimension_numbers = #tpu.dot_dimension_numbers<[1], [0], [0], [1], [0, 0, 1, 1], [], []>} : vector<8x128xf32>, vector<128x3xf32>, vector<8x3xf32> -> vector<8x3xf32>
    %c0_15 = arith.constant 0 : index
    %c0_16 = arith.constant 0 : index
    %17 = vector.load %arg7[%c0_15, %c0_16] : memref<1x3xf32, #tpu.memory_space<vmem>>, vector<1x3xf32>
    %18 = vector.broadcast %17 : vector<1x3xf32> to vector<8x3xf32>
    %19 = arith.addf %16, %18 : vector<8x3xf32>
    %cst_17 = arith.constant dense<0xFF800000> : vector<8xf32>
    %20 = vector.multi_reduction <maximumf>, %19, %cst_17 [1] : vector<8x3xf32> to vector<8xf32>
    %21 = vector.shape_cast %20 : vector<8xf32> to vector<8x1xf32>
    %22 = vector.broadcast %21 : vector<8x1xf32> to vector<8x3xf32>
    %23 = arith.subf %19, %22 : vector<8x3xf32>
    %24 = math.exp %23 : vector<8x3xf32>
    %cst_18 = arith.constant dense<0.000000e+00> : vector<8xf32>
    %25 = vector.multi_reduction <add>, %24, %cst_18 [1] : vector<8x3xf32> to vector<8xf32>
    %26 = vector.shape_cast %25 : vector<8xf32> to vector<8x1xf32>
    %27 = vector.broadcast %26 : vector<8x1xf32> to vector<8x3xf32>
    %28 = arith.divf %24, %27 : vector<8x3xf32>
    %c0_19 = arith.constant 0 : index
    %c0_20 = arith.constant 0 : index
    %29 = vector.load %arg8[%c0_19, %c0_20] : memref<8x3xf32, #tpu.memory_space<vmem>>, vector<8x3xf32>
    tpu.vector_store %arg8[%c0_19, %c0_20], %28 {strides = array<i32>} : memref<8x3xf32, #tpu.memory_space<vmem>>, vector<8x3xf32>,
    return
  }
  func.func @transform_0(%arg0: i32) -> (i32, i32) {
    %c0_i32 = arith.constant 0 : i32
    %c0_i32_0 = arith.constant 0 : i32
    return %arg0, %c0_i32 : i32, i32
  }
  func.func @transform_1(%arg0: i32) -> (i32, i32) {
    %c0_i32 = arith.constant 0 : i32
    %c0_i32_0 = arith.constant 0 : i32
    %c0_i32_1 = arith.constant 0 : i32
    return %c0_i32, %c0_i32_0 : i32, i32
  }
  func.func @transform_2(%arg0: i32) -> (i32, i32) {
    %c0_i32 = arith.constant 0 : i32
    %c0_i32_0 = arith.constant 0 : i32
    %c0_i32_1 = arith.constant 0 : i32
    return %c0_i32, %c0_i32_0 : i32, i32
  }
  func.func @transform_3(%arg0: i32) -> (i32, i32) {
    %c0_i32 = arith.constant 0 : i32
    %c0_i32_0 = arith.constant 0 : i32
    %c0_i32_1 = arith.constant 0 : i32
    return %c0_i32, %c0_i32_0 : i32, i32
  }
  func.func @transform_4(%arg0: i32) -> (i32, i32) {
    %c0_i32 = arith.constant 0 : i32
    %c0_i32_0 = arith.constant 0 : i32
    %c0_i32_1 = arith.constant 0 : i32
    return %c0_i32, %c0_i32_0 : i32, i32
  }
  func.func @transform_5(%arg0: i32) -> (i32, i32) {
    %c0_i32 = arith.constant 0 : i32
    %c0_i32_0 = arith.constant 0 : i32
    %c0_i32_1 = arith.constant 0 : i32
    return %c0_i32, %c0_i32_0 : i32, i32
  }
  func.func @transform_6(%arg0: i32) -> (i32, i32) {
    %c0_i32 = arith.constant 0 : i32
    %c0_i32_0 = arith.constant 0 : i32
    %c0_i32_1 = arith.constant 0 : i32
    return %c0_i32, %c0_i32_0 : i32, i32
  }
  func.func @transform_7(%arg0: i32) -> (i32, i32) {
    %c0_i32 = arith.constant 0 : i32
    %c0_i32_0 = arith.constant 0 : i32
    return %arg0, %c0_i32 : i32, i32
  }
}

</mosaic_0001>

<bundles_post_ra>
// kernel: hand_mlp_forward.1
= control target key start
LH: loop header
LB: loop body
LE: loop exit
PB: predicated region body
PF: predicated region fallthrough
CT: control target
= control target key end

     0   :  { %12 = vsyncpa [#allocation3], 0  ;;  %s562_s24 = smov [#allocation2]   ;;  %s757_s0 = inlined_call_operand.vmem [shape: f32[8,42], index: 0, kind: input, shape index: {}]   ;;  %s758_s1 = inlined_call_operand.hbm [shape: f32[42,128], index: 1, kind: input, shape index: {}]   ;;  %s759_s2 = inlined_call_operand.vmem [shape: f32[1,128], index: 2, kind: input, shape index: {}]   ;;  %s760_s3 = inlined_call_operand.vmem [shape: f32[128,128], index: 3, kind: input, shape index: {}]   ;;  %s761_s4 = inlined_call_operand.vmem [shape: f32[1,128], index: 4, kind: input, shape index: {}]   ;;  %s762_s5 = inlined_call_operand.vmem [shape: f32[128,3], index: 5, kind: input, shape index: {}]   ;;  %s763_s6 = inlined_call_operand.vmem [shape: f32[1,3], index: 6, kind: input, shape index: {}]   ;;  %s764_s7 = inlined_call_operand.vmem [shape: f32[8,3], index: 7, kind: output, shape index: {}]  }
   0x1   :  { %s20_s25 = sshll.u32 %s562_s24, 4  ;;  %s538_s28 = scalar_lea.hbm %s758_s1, 768  ;;  %s21_s25 = int_to_ptr.vmem [resolvable:$true] %s20_s25 }
   0x2   :  { %p539_p0 = scmp.ne.s32.totalorder %s758_s1, %s538_s28  ;;  %p542_p1 = scmp.lt.u32.totalorder %s538_s28, %s758_s1 }
   0x4   :  { %p544_p2 = pnand %p542_p1, %p539_p0 }
   0x6   :  { %547 = shalt.err (!%p544_p2)
}
   0x7   :  { %s548_s10 = scalar_lea.vmem %s21_s25, 768  ;;  %p553_p4 = scmp.lt.s32.totalorder %s21_s25, %s21_s25 }
   0x8   :  { %p549_p3 = scmp.ne.s32.totalorder %s21_s25, %s548_s10  ;;  %p554_p5 = scmp.lt.s32.totalorder %s548_s10, %s548_s10 }
   0xa   :  { %p555_p6 = por %p554_p5, %p553_p4 }
   0xc   :  { %p556_p7 = pnand %p555_p6, %p549_p3 }
   0xe   :  { %559 = shalt.err (!%p556_p7)
}
   0xf   :  { %s563_s11 = smov 128   ;;  %s564_s12 = smov 8  }
  0x10   :  { %26 = dma.hbm_to_vmem [thread:$0]  %s758_s1, 768, %s21_s25, [#allocation3], %s563_s11, %s563_s11, %s564_s12  }
  0x11   :  { %560 = dma.done.wait [#allocation3], 768  }
  0x12   :  { %561 = vsyncadd [#allocation3], 4294966528  ;;  %v565_v0 = vmov 0.0|0.0   ;;  %vm566_vm0 = vmmov 0   ;;  %v567_v1 = vmov 0.0   ;;  %v41_v2 = vld [vmem:[#allocation2] sm:$0xff] }
  0x13   :  { %469 = vmatprep.subr.bf16.mxu0 %v565_v0  ;;  %479 = vmatprep.subr.bf16.mxu1 %v565_v0  ;;  %v42_v3 = vld [vmem:[#allocation2 + $0x8] sm:$0xff]  ;;  %v43_v4 = vld [vmem:[#allocation2 + $0x10] sm:$0xff]  ;;  %v44_v6 = vld [vmem:[#allocation2 + $0x18] sm:$0xff]  ;;  %vm58_vm1 = vcmask 1041408   ;;  %vm568_vm2 = vmmov 1   ;;  %vm54_vm4 = vcmask 343040  }
  0x14   :  { %396 = vmatprep.mubr.msk.f32.mxu0 %vm566_vm0, %v567_v1  ;;  %431 = vmatprep.mubr.msk.f32.mxu1 %vm566_vm0, %v567_v1  ;;  %v470_v5 = vpack.c.bf16 %v42_v3, %v41_v2  ;;  %v133_v7 = vld [vmem:[%s760_s3] sm:$0xff]  ;;  %v134_v8 = vld [vmem:[%s760_s3 + $0x8] sm:$0xff]  ;;  %v473_v9 = vpack.c.bf16 %v44_v6, %v43_v4  ;;  %v135_v11 = vld [vmem:[%s760_s3 + $0x10] sm:$0xff]  ;;  %vm320_vm5 = vcmask 23552  }
  0x15   :  { %v480_v10 = vpack.c.bf16 %v134_v8, %v133_v7  ;;  %v136_v12 = vld [vmem:[%s760_s3 + $0x18] sm:$0xff]  ;;  %v45_v13 = vld [vmem:[#allocation2 + $0x20] sm:$0xff]  ;;  %v46_v14 = vld [vmem:[#allocation2 + $0x28] sm:$0x3] }
  0x16   :  { %471 = vmatpush3.bf16.msra.mxu0 %v470_v5  ;;  %v483_v15 = vpack.c.bf16 %v136_v12, %v135_v11  ;;  %v137_v16 = vld [vmem:[%s760_s3 + $0x20] sm:$0xff]  ;;  %v138_v17 = vld [vmem:[%s760_s3 + $0x28] sm:$0xff]  ;;  %v476_v18 = vpack.c.bf16 %v46_v14, %v45_v13  ;;  %vm477_vm3 = vmpackc.low %vm58_vm1, %vm568_vm2 }
  0x17   :  { %472 = vmatprep.subr.bf16.mxu0 %v565_v0  ;;  %481 = vmatpush3.bf16.msra.mxu1 %v480_v10  ;;  %v486_v19 = vpack.c.bf16 %v138_v17, %v137_v16  ;;  %v139_v20 = vld [vmem:[%s760_s3 + $0x30] sm:$0xff]  ;;  %v140_v21 = vld [vmem:[%s760_s3 + $0x38] sm:$0xff]  ;;  %v40_v22 = vld [vmem:[%s757_s0] sm:$0xff] }
  0x18   :  { %482 = vmatprep.subr.bf16.mxu1 %v565_v0  ;;  %v489_v23 = vpack.c.bf16 %v140_v21, %v139_v20  ;;  %v141_v24 = vld [vmem:[%s760_s3 + $0x40] sm:$0xff]  ;;  %v142_v25 = vld [vmem:[%s760_s3 + $0x48] sm:$0xff]  ;;  %v143_v27 = vld [vmem:[%s760_s3 + $0x50] sm:$0xff] }
  0x19   :  { %v492_v26 = vpack.c.bf16 %v142_v25, %v141_v24  ;;  %v144_v28 = vld [vmem:[%s760_s3 + $0x58] sm:$0xff]  ;;  %v145_v30 = vld [vmem:[%s760_s3 + $0x60] sm:$0xff]  ;;  %v146_v31 = vld [vmem:[%s760_s3 + $0x68] sm:$0xff] }
  0x1a   :  { %474 = vmatpush3.bf16.msra.mxu0 %v473_v9  ;;  %v495_v29 = vpack.c.bf16 %v144_v28, %v143_v27  ;;  %v498_v32 = vpack.c.bf16 %v146_v31, %v145_v30  ;;  %v147_v33 = vld [vmem:[%s760_s3 + $0x70] sm:$0xff]  ;;  %v148_v34 = vld [vmem:[%s760_s3 + $0x78] sm:$0xff]  ;;  %v227_v36 = vld [vmem:[%s762_s5] sm:$0xff] }
  0x1b   :  { %475 = vmatprep.subr.bf16.mxu0 %v565_v0  ;;  %484 = vmatpush3.bf16.msra.mxu1 %v483_v15  ;;  %v501_v35 = vpack.c.bf16 %v148_v34, %v147_v33  ;;  %v228_v37 = vld [vmem:[%s762_s5 + $0x8] sm:$0xff]  ;;  %v229_v38 = vld [vmem:[%s762_s5 + $0x10] sm:$0xff]  ;;  %v230_v40 = vld [vmem:[%s762_s5 + $0x18] sm:$0xff] }
  0x1c   :  { %485 = vmatprep.subr.bf16.mxu1 %v565_v0  ;;  %v504_v39 = vpack.c.bf16 %v228_v37, %v227_v36  ;;  %v507_v41 = vpack.c.bf16 %v230_v40, %v229_v38  ;;  %v231_v42 = vld [vmem:[%s762_s5 + $0x20] sm:$0xff]  ;;  %v232_v43 = vld [vmem:[%s762_s5 + $0x28] sm:$0xff]  ;;  %v233_v45 = vld [vmem:[%s762_s5 + $0x30] sm:$0xff] }
  0x1d   :  { %v510_v44 = vpack.c.bf16 %v232_v43, %v231_v42  ;;  %v234_v46 = vld [vmem:[%s762_s5 + $0x38] sm:$0xff]  ;;  %v235_v48 = vld [vmem:[%s762_s5 + $0x40] sm:$0xff]  ;;  %v236_v49 = vld [vmem:[%s762_s5 + $0x48] sm:$0xff] }
  0x1e   :  { %478 = vmatpush3.bf16.msk.msra.mxu0 %vm477_vm3, %v476_v18  ;;  %v513_v47 = vpack.c.bf16 %v234_v46, %v233_v45  ;;  %v516_v50 = vpack.c.bf16 %v236_v49, %v235_v48  ;;  %v237_v51 = vld [vmem:[%s762_s5 + $0x50] sm:$0xff]  ;;  %v238_v52 = vld [vmem:[%s762_s5 + $0x58] sm:$0xff]  ;;  %v239_v54 = vld [vmem:[%s762_s5 + $0x60] sm:$0xff] }
  0x1f   :  { %503 = vmatprep.subr.bf16.mxu0 %v565_v0  ;;  %487 = vmatpush3.bf16.msra.mxu1 %v486_v19  ;;  %v519_v53 = vpack.c.bf16 %v238_v52, %v237_v51  ;;  %v240_v55 = vld [vmem:[%s762_s5 + $0x68] sm:$0xff]  ;;  %v338_v57 = vld [vmem:[%s759_s2] ss:$0 sm:$0xff]  ;;  %v241_v62 = vld [vmem:[%s762_s5 + $0x70] sm:$0xff] }
  0x20   :  { %488 = vmatprep.subr.bf16.mxu1 %v565_v0  ;;  %v522_v56 = vpack.c.bf16 %v240_v55, %v239_v54  ;;  %v242_v63 = vld [vmem:[%s762_s5 + $0x78] sm:$0xff]  ;;  %v342_v6 = vld [vmem:[%s763_s6] ss:$0 sm:$0xff] }
  0x21   :  { %397 = vmatmul.mubr.msk.f32.vlgmr.msra.gmra.mrb[0].mxu0 %vm54_vm4, %v40_v22 }
  0x22   :  { %466 = vmatprep.mubr.msk.f32.mxu0 %vm566_vm0, %v567_v1  ;;  %505 = vmatpush3.bf16.msra.mxu0 %v504_v39  ;;  %v525_v1 = vpack.c.bf16 %v242_v63, %v241_v62 }
  0x23   :  { %490 = vmatpush3.bf16.msra.mxu1 %v489_v23  ;;  %506 = vmatprep.subr.bf16.mxu0 %v565_v0 }
  0x24   :  { %491 = vmatprep.subr.bf16.mxu1 %v565_v0 }
  0x26   :  { %508 = vmatpush3.bf16.msra.mxu0 %v507_v41 }
  0x27   :  { %493 = vmatpush3.bf16.msra.mxu1 %v492_v26  ;;  %509 = vmatprep.subr.bf16.mxu0 %v565_v0 }
  0x28   :  { %494 = vmatprep.subr.bf16.mxu1 %v565_v0 }
  0x2a   :  { %511 = vmatpush3.bf16.msra.mxu0 %v510_v44 }
  0x2b   :  { %496 = vmatpush3.bf16.msra.mxu1 %v495_v29  ;;  %512 = vmatprep.subr.bf16.mxu0 %v565_v0 }
  0x2c   :  { %497 = vmatprep.subr.bf16.mxu1 %v565_v0 }
  0x2e   :  { %514 = vmatpush3.bf16.msra.mxu0 %v513_v47 }
  0x2f   :  { %499 = vmatpush3.bf16.msra.mxu1 %v498_v32  ;;  %515 = vmatprep.subr.bf16.mxu0 %v565_v0 }
  0x30   :  { %500 = vmatprep.subr.bf16.mxu1 %v565_v0 }
  0x32   :  { %517 = vmatpush3.bf16.msra.mxu0 %v516_v50 }
  0x33   :  { %502 = vmatpush3.bf16.msra.mxu1 %v501_v35  ;;  %518 = vmatprep.subr.bf16.mxu0 %v565_v0 }
  0x36   :  { %520 = vmatpush3.bf16.msra.mxu0 %v519_v53 }
  0x37   :  { %521 = vmatprep.subr.bf16.mxu0 %v565_v0 }
  0x3a   :  { %523 = vmatpush3.bf16.msra.mxu0 %v522_v56 }
  0x3b   :  { %524 = vmatprep.subr.bf16.mxu0 %v565_v0  ;;  %v341_v0 = vld [vmem:[%s761_s4] ss:$0 sm:$0xff] }
  0x3e   :  { %526 = vmatpush3.bf16.msra.mxu0 %v525_v1 }
  0xf4   :  { %v128_v58 = vpop.f32.mrb[0].mxu0 }
  0xf5   :  { %v129_v59 = vadd.f32 %v338_v57, %v128_v58  ;;  %v398_v60 = vpop.f32.mrb[1].mxu0 }
  0xf7   :  { %v132_v61 = vmax.f32 %v129_v59, 0.0 }
  0xf9   :  { %432 = vmatmul.mubr.f32.vlgmr.msra.gmra.mrb[0].mxu1 %v132_v61 }
 0x1cc   :  { %v222_v2 = vpop.f32.mrb[0].mxu1 }
 0x1cd   :  { %v223_v3 = vadd.f32 %v341_v0, %v222_v2  ;;  %v433_v4 = vpop.f32.mrb[1].mxu1 }
 0x1cf   :  { %v226_v5 = vmax.f32 %v223_v3, 0.0 }
 0x1d1   :  { %467 = vmatmul.mubr.f32.vlgmr.msra.gmra.mrb[2].mxu0 %v226_v5 }
 0x2a4   :  { %v316_v7 = vpop.f32.mrb[2].mxu0 }
 0x2a5   :  { %v317_v8 = vadd.f32 %v342_v6, %v316_v7  ;;  %v468_v9 = vpop.f32.mrb[3].mxu0 }
 0x2a7   :  { %v321_v10 = vsel %vm320_vm5, %v317_v8, -inf }
 0x2a8   :  { %322 = vmax.xlane.f32.xlu0 %v321_v10 }
 0x335   :  { %v323_v11 = vpop.xlane.xlu0 %322 }
 0x336   :  { %v324_v12 = vsub.f32 %v317_v8, %v323_v11 }
 0x338   :  { %v325_v13 = vmul.f32 1.442695, %v324_v12 }
 0x33a   :  { %534 = vpow2.f32 %v325_v13 }
 0x344   :  { %v535_v14 = vpop.eup %534 }
 0x345   :  { %v327_v15 = vsel %vm320_vm5, %v535_v14, 0.0 }
 0x346   :  { %328 = vadd.xlane.f32.xlu0 %v327_v15 }
 0x3d3   :  { %v329_v16 = vpop.xlane.xlu0 %328 }
 0x3d4   :  { %536 = vrcp.f32 %v329_v16 }
 0x3de   :  { %v537_v17 = vpop.eup %536 }
 0x3df   :  { %v331_v18 = vmul.f32 %v537_v17, %v535_v14 }
 0x3e1   :  { %332 = vst.msk [vmem:[%s764_s7] sm:$0xff] %vm320_vm5, %v331_v18 }
 0x3e2   :  { %337 = vsyncpa [#allocation3], 1 }

</bundles_post_ra>
